<compile_context>
chip_gen: v6e
topology: v6e:2x2x1
jax: 0.10.0
libtpu: 0.0.40
codegen_flags: <defaults>
</compile_context>

<pallas_src>
import jax
import jax.numpy as jnp
from jax.experimental import pallas as pl
from jax.experimental.pallas import tpu as pltpu


def critic_kernel(s_ref, a_ref, w1_ref, b1_ref, w2_ref, b2_ref, w3_ref, b3_ref,
                  o_ref):
    mm_dt = w1_ref.dtype  # MXU operand dtype (bf16 by default); accumulation is f32

    # Layer 1: in-kernel lane concat (S+A = 32 lanes) -> single MXU pass.
    sa = jnp.concatenate([s_ref[...], a_ref[...]], axis=-1).astype(mm_dt)
    h = jnp.dot(sa, w1_ref[...], preferred_element_type=jnp.float32)
    h = jnp.maximum(h + b1_ref[...], 0.0)                     # f32 bias + ReLU (VPU)

    # Layer 2.
    h = jnp.dot(h.astype(mm_dt), w2_ref[...], preferred_element_type=jnp.float32)
    h = jnp.maximum(h + b2_ref[...], 0.0)

    # Layer 3 (H -> 1), lane-dense: (1,H) x (tb,H)^T -> (1, tb)  (q @ k.T pattern),
    # so the output row is already laid out along lanes -- unmasked stores.
    q = jax.lax.dot_general(
        w3_ref[...].astype(mm_dt), h.astype(mm_dt),
        dimension_numbers=(((1,), (1,)), ((), ())),
        preferred_element_type=jnp.float32)
    o_ref[...] = q + b3_ref[0, 0]                              # scalar bias from SMEM


def _default_num_batch_tiles():
    # v5e / v6e: 1 TensorCore -> single grid step (the ~0.35us/step loop
    # overhead dominates at this problem size). v7x: 2 TCs -> 2 parallel tiles.
    try:
        kind = jax.devices()[0].device_kind.lower()
        if "v7" in kind:
            return 2
    except Exception:
        pass
    return 1


def critic_forward(state, action, params, *, num_batch_tiles=None):
    """state: (B, S) f32, action: (B, A) f32 -> q: (B, 1) f32."""
    w1, b1, w2, b2, w3, b3 = params
    B, S = state.shape
    A = action.shape[-1]
    H = w2.shape[-1]
    assert w1.shape == (S + A, H)

    if num_batch_tiles is None:
        num_batch_tiles = _default_num_batch_tiles()

    # Batch tiling. Multi-tile => tb must be a multiple of 128 so the (1, tb)
    # lane-dense output blocks stay lane-aligned; single tile => tb = B exactly
    # (full-array blocks, no alignment constraint, no host-side padding).
    if num_batch_tiles > 1:
        tb = pl.cdiv(B, num_batch_tiles * 128) * 128
        if tb * (num_batch_tiles - 1) >= B:   # not enough rows to keep every tile busy
            num_batch_tiles = 1
    if num_batch_tiles == 1:
        tb = B
    b_out = num_batch_tiles * tb
    grid = (num_batch_tiles,)

    resident = lambda i: (0, 0)  # weights/biases: same block every grid step

    wbytes = sum(int(x.size) * x.dtype.itemsize for x in (w1, b1, w2, b2, w3, b3))

    out = pl.pallas_call(
        critic_kernel,
        out_shape=jax.ShapeDtypeStruct((1, b_out), jnp.float32),
        grid=grid,
        in_specs=[
            pl.BlockSpec((tb, S), lambda i: (i, 0)),             # state tile
            pl.BlockSpec((tb, A), lambda i: (i, 0)),             # action tile
            pl.BlockSpec((S + A, H), resident),                  # w1 (combined)
            pl.BlockSpec((1, H), resident),                      # b1
            pl.BlockSpec((H, H), resident),                      # w2
            pl.BlockSpec((1, H), resident),                      # b2
            pl.BlockSpec((1, H), resident),                      # w3 row
            pl.BlockSpec(memory_space=pltpu.MemorySpace.SMEM),   # b3 scalar
        ],
        out_specs=pl.BlockSpec((1, tb), lambda i: (0, i)),       # lane-dense q row
        compiler_params=pltpu.CompilerParams(
            dimension_semantics=("parallel",)),                  # batch tiles across TCs
        cost_estimate=pl.CostEstimate(
            flops=2 * b_out * ((S + A) * H + H * H + H),
            transcendentals=0,
            bytes_accessed=4 * B * (S + A) + 4 * b_out + wbytes),
    )(state, action, w1, b1, w2, b2, w3, b3)

    return out[0, :B].reshape(B, 1)


def critic_reference(state, action, params):
    """Pure-JAX reference mirroring the kernel's operand dtypes / f32 accumulation."""
    w1, b1, w2, b2, w3, b3 = params
    dt = w1.dtype
    sa = jnp.concatenate([state, action], axis=-1).astype(dt)
    h = jnp.dot(sa, w1, preferred_element_type=jnp.float32)
    h = jnp.maximum(h + b1, 0.0)
    h = jnp.dot(h.astype(dt), w2, preferred_element_type=jnp.float32)
    h = jnp.maximum(h + b2, 0.0)
    q = jnp.dot(h.astype(dt), jnp.transpose(w3).astype(dt),
                preferred_element_type=jnp.float32)
    return q + b3


def init_critic_params(key, state_dim, action_dim, hidden=256,
                       matmul_dtype=jnp.bfloat16):
    """nn.Linear-style uniform(+-1/sqrt(fan_in)) init.

    Weights (MXU operands) are pre-cast ONCE to `matmul_dtype` (bf16 default =
    the native MXU path on v5e/v6e/v7x); biases stay f32.
    """
    k1, kb1, k2, kb2, k3, kb3 = jax.random.split(key, 6)
    in1 = state_dim + action_dim
    bound1 = 1.0 / in1 ** 0.5
    w1 = jax.random.uniform(k1, (in1, hidden), jnp.float32, -bound1, bound1)
    b1 = jax.random.uniform(kb1, (1, hidden), jnp.float32, -bound1, bound1)
    bound2 = 1.0 / hidden ** 0.5
    w2 = jax.random.uniform(k2, (hidden, hidden), jnp.float32, -bound2, bound2)
    b2 = jax.random.uniform(kb2, (1, hidden), jnp.float32, -bound2, bound2)
    w3 = jax.random.uniform(k3, (1, hidden), jnp.float32, -bound2, bound2)
    b3 = jax.random.uniform(kb3, (1, 1), jnp.float32, -bound2, bound2)
    return (w1.astype(matmul_dtype), b1, w2.astype(matmul_dtype), b2,
            w3.astype(matmul_dtype), b3)


if __name__ == "__main__":
    STATE_DIM, ACTION_DIM, HIDDEN = 24, 8, 256

    key = jax.random.PRNGKey(0)
    kp, ks, ka, ks2, ka2, ks3, ka3 = jax.random.split(key, 7)

    # Case 1: tiny batch, f32 weights (exact path), single grid step.
    params_f32 = init_critic_params(kp, STATE_DIM, ACTION_DIM, HIDDEN,
                                    matmul_dtype=jnp.float32)
    B1 = 8
    s1 = jax.random.normal(ks, (B1, STATE_DIM), jnp.float32)
    a1 = jax.random.normal(ka, (B1, ACTION_DIM), jnp.float32)
    q1 = jax.block_until_ready(critic_forward(s1, a1, params_f32))
    r1 = critic_reference(s1, a1, params_f32)
    assert q1.shape == (B1, 1)
    assert jnp.allclose(q1, r1, atol=1e-3, rtol=1e-3)

    # Case 2: bf16 MXU weights (default fast path), device-default tiling.
    params = init_critic_params(kp, STATE_DIM, ACTION_DIM, HIDDEN)
    B2 = 256
    s2 = jax.random.normal(ks2, (B2, STATE_DIM), jnp.float32)
    a2 = jax.random.normal(ka2, (B2, ACTION_DIM), jnp.float32)
    q2 = jax.block_until_ready(critic_forward(s2, a2, params))
    r2 = critic_reference(s2, a2, params)
    assert q2.shape == (B2, 1)
    assert jnp.allclose(q2, r2, atol=2e-2, rtol=2e-2)

    # Case 3: force the 2-tile grid path (v7x-style) with a ragged last tile
    # (B=200, tb=128): exercises multi-step grid + OOB-padded input reads.
    B3 = 200
    s3 = jax.random.normal(ks3, (B3, STATE_DIM), jnp.float32)
    a3 = jax.random.normal(ka3, (B3, ACTION_DIM), jnp.float32)
    q3 = jax.block_until_ready(critic_forward(s3, a3, params, num_batch_tiles=2))
    r3 = critic_reference(s3, a3, params)
    assert q3.shape == (B3, 1)
    assert jnp.allclose(q3, r3, atol=2e-2, rtol=2e-2)

    print("KERNEL_OK")
</pallas_src>

<mosaic_0001>
module attributes {stable_mosaic.version = 11 : i64} {
  func.func @critic_kernel(%arg0: i32, %arg1: memref<8x24xf32, #tpu.memory_space<vmem>>, %arg2: memref<8x8xf32, #tpu.memory_space<vmem>>, %arg3: memref<32x256xf32, #tpu.memory_space<vmem>>, %arg4: memref<1x256xf32, #tpu.memory_space<vmem>>, %arg5: memref<256x256xf32, #tpu.memory_space<vmem>>, %arg6: memref<1x256xf32, #tpu.memory_space<vmem>>, %arg7: memref<1x256xf32, #tpu.memory_space<vmem>>, %arg8: memref<1x1xf32, #tpu.memory_space<smem>>, %arg9: memref<1x8xf32, #tpu.memory_space<vmem>>) attributes {dimension_semantics = [#tpu.dimension_semantics<parallel>], iteration_bounds = array<i64: 1>, scalar_prefetch = 0 : i64, scratch_operands = 0 : i64, tpu.core_type = #tpu.core_type<tc>, window_params = [{transform_indices = @transform_0, window_bounds = array<i64: 8, 24>}, {transform_indices = @transform_1, window_bounds = array<i64: 8, 8>}, {pipeline_mode = #tpu.pipeline_mode<synchronous>, transform_indices = @transform_2, window_bounds = array<i64: 32, 256>}, {pipeline_mode = #tpu.pipeline_mode<synchronous>, transform_indices = @transform_3, window_bounds = array<i64: 1, 256>}, {pipeline_mode = #tpu.pipeline_mode<synchronous>, transform_indices = @transform_4, window_bounds = array<i64: 256, 256>}, {pipeline_mode = #tpu.pipeline_mode<synchronous>, transform_indices = @transform_5, window_bounds = array<i64: 1, 256>}, {pipeline_mode = #tpu.pipeline_mode<synchronous>, transform_indices = @transform_6, window_bounds = array<i64: 1, 256>}, {transform_indices = @transform_7, window_bounds = array<i64: 1, 1>}, {transform_indices = @transform_8, window_bounds = array<i64: 1, 8>}]} {
    %c0 = arith.constant 0 : index
    %c0_0 = arith.constant 0 : index
    %0 = vector.load %arg1[%c0, %c0_0] : memref<8x24xf32, #tpu.memory_space<vmem>>, vector<8x24xf32>
    %c0_1 = arith.constant 0 : index
    %c0_2 = arith.constant 0 : index
    %1 = vector.load %arg2[%c0_1, %c0_2] : memref<8x8xf32, #tpu.memory_space<vmem>>, vector<8x8xf32>
    %2 = tpu.concatenate %0, %1 in 1 : vector<8x24xf32>, vector<8x8xf32> -> vector<8x32xf32>
    %c0_3 = arith.constant 0 : index
    %c0_4 = arith.constant 0 : index
    %3 = vector.load %arg3[%c0_3, %c0_4] : memref<32x256xf32, #tpu.memory_space<vmem>>, vector<32x256xf32>
    %cst = arith.constant dense<0.000000e+00> : vector<8x256xf32>
    %4 = tpu.matmul %2, %3, %cst {dimension_numbers = #tpu.dot_dimension_numbers<[1], [0], [0], [1], [0, 0, 1, 1], [], []>} : vector<8x32xf32>, vector<32x256xf32>, vector<8x256xf32> -> vector<8x256xf32>
    %c0_5 = arith.constant 0 : index
    %c0_6 = arith.constant 0 : index
    %5 = vector.load %arg4[%c0_5, %c0_6] : memref<1x256xf32, #tpu.memory_space<vmem>>, vector<1x256xf32>
    %6 = vector.broadcast %5 : vector<1x256xf32> to vector<8x256xf32>
    %7 = arith.addf %4, %6 : vector<8x256xf32>
    %cst_7 = arith.constant 0.000000e+00 : f32
    %8 = vector.broadcast %cst_7 : f32 to vector<8x256xf32>
    %9 = arith.maximumf %7, %8 : vector<8x256xf32>
    %c0_8 = arith.constant 0 : index
    %c0_9 = arith.constant 0 : index
    %10 = vector.load %arg5[%c0_8, %c0_9] : memref<256x256xf32, #tpu.memory_space<vmem>>, vector<256x256xf32>
    %cst_10 = arith.constant dense<0.000000e+00> : vector<8x256xf32>
    %11 = tpu.matmul %9, %10, %cst_10 {dimension_numbers = #tpu.dot_dimension_numbers<[1], [0], [0], [1], [0, 0, 1, 1], [], []>} : vector<8x256xf32>, vector<256x256xf32>, vector<8x256xf32> -> vector<8x256xf32>
    %c0_11 = arith.constant 0 : index
    %c0_12 = arith.constant 0 : index
    %12 = vector.load %arg6[%c0_11, %c0_12] : memref<1x256xf32, #tpu.memory_space<vmem>>, vector<1x256xf32>
    %13 = vector.broadcast %12 : vector<1x256xf32> to vector<8x256xf32>
    %14 = arith.addf %11, %13 : vector<8x256xf32>
    %cst_13 = arith.constant 0.000000e+00 : f32
    %15 = vector.broadcast %cst_13 : f32 to vector<8x256xf32>
    %16 = arith.maximumf %14, %15 : vector<8x256xf32>
    %c0_14 = arith.constant 0 : index
    %c0_15 = arith.constant 0 : index
    %17 = vector.load %arg7[%c0_14, %c0_15] : memref<1x256xf32, #tpu.memory_space<vmem>>, vector<1x256xf32>
    %cst_16 = arith.constant dense<0.000000e+00> : vector<1x8xf32>
    %18 = tpu.matmul %17, %16, %cst_16 {dimension_numbers = #tpu.dot_dimension_numbers<[1], [1], [0], [0], [0, 0, 1, 0], [], []>} : vector<1x256xf32>, vector<8x256xf32>, vector<1x8xf32> -> vector<1x8xf32>
    %c0_17 = arith.constant 0 : index
    %c0_18 = arith.constant 0 : index
    %19 = memref.load %arg8[%c0_17, %c0_18] : memref<1x1xf32, #tpu.memory_space<smem>>
    %20 = vector.broadcast %19 : f32 to vector<1x8xf32>
    %21 = arith.addf %18, %20 : vector<1x8xf32>
    %c0_19 = arith.constant 0 : index
    %c0_20 = arith.constant 0 : index
    %22 = vector.load %arg9[%c0_19, %c0_20] : memref<1x8xf32, #tpu.memory_space<vmem>>, vector<1x8xf32>
    tpu.vector_store %arg9[%c0_19, %c0_20], %21 {strides = array<i32>} : memref<1x8xf32, #tpu.memory_space<vmem>>, vector<1x8xf32>,
    return
  }
  func.func @transform_0(%arg0: i32) -> (i32, i32) {
    %c0_i32 = arith.constant 0 : i32
    %c0_i32_0 = arith.constant 0 : i32
    return %arg0, %c0_i32 : i32, i32
  }
  func.func @transform_1(%arg0: i32) -> (i32, i32) {
    %c0_i32 = arith.constant 0 : i32
    %c0_i32_0 = arith.constant 0 : i32
    return %arg0, %c0_i32 : i32, i32
  }
  func.func @transform_2(%arg0: i32) -> (i32, i32) {
    %c0_i32 = arith.constant 0 : i32
    %c0_i32_0 = arith.constant 0 : i32
    %c0_i32_1 = arith.constant 0 : i32
    return %c0_i32, %c0_i32_0 : i32, i32
  }
  func.func @transform_3(%arg0: i32) -> (i32, i32) {
    %c0_i32 = arith.constant 0 : i32
    %c0_i32_0 = arith.constant 0 : i32
    %c0_i32_1 = arith.constant 0 : i32
    return %c0_i32, %c0_i32_0 : i32, i32
  }
  func.func @transform_4(%arg0: i32) -> (i32, i32) {
    %c0_i32 = arith.constant 0 : i32
    %c0_i32_0 = arith.constant 0 : i32
    %c0_i32_1 = arith.constant 0 : i32
    return %c0_i32, %c0_i32_0 : i32, i32
  }
  func.func @transform_5(%arg0: i32) -> (i32, i32) {
    %c0_i32 = arith.constant 0 : i32
    %c0_i32_0 = arith.constant 0 : i32
    %c0_i32_1 = arith.constant 0 : i32
    return %c0_i32, %c0_i32_0 : i32, i32
  }
  func.func @transform_6(%arg0: i32) -> (i32, i32) {
    %c0_i32 = arith.constant 0 : i32
    %c0_i32_0 = arith.constant 0 : i32
    %c0_i32_1 = arith.constant 0 : i32
    return %c0_i32, %c0_i32_0 : i32, i32
  }
  func.func @transform_7(%arg0: i32) -> (i32, i32) {
    %c0_i32 = arith.constant 0 : i32
    %c0_i32_0 = arith.constant 0 : i32
    %c0_i32_1 = arith.constant 0 : i32
    return %c0_i32, %c0_i32_0 : i32, i32
  }
  func.func @transform_8(%arg0: i32) -> (i32, i32) {
    %c0_i32 = arith.constant 0 : i32
    %c0_i32_0 = arith.constant 0 : i32
    return %c0_i32, %arg0 : i32, i32
  }
}

</mosaic_0001>

<bundles_post_ra>
// kernel: tpu_custom_call.1
= control target key start
LH: loop header
LB: loop body
LE: loop exit
PB: predicated region body
PF: predicated region fallthrough
CT: control target
= control target key end

     0   :  { %14 = vsyncpa [#allocation4], 0  ;;  %s638_s0 = inlined_call_operand.hbm [shape: f32[8,24], index: 0, kind: input, shape index: {}]   ;;  %s639_s1 = inlined_call_operand.hbm [shape: f32[8,8], index: 1, kind: input, shape index: {}]   ;;  %s640_s2 = inlined_call_operand.hbm [shape: f32[32,256], index: 2, kind: input, shape index: {}]   ;;  %s641_s3 = inlined_call_operand.vmem [shape: f32[1,256], index: 3, kind: input, shape index: {}]   ;;  %s642_s4 = inlined_call_operand.hbm [shape: f32[256,256], index: 4, kind: input, shape index: {}]   ;;  %s643_s5 = inlined_call_operand.vmem [shape: f32[1,256], index: 5, kind: input, shape index: {}]   ;;  %s644_s6 = inlined_call_operand.vmem [shape: f32[1,256], index: 6, kind: input, shape index: {}]   ;;  %s645_s7 = inlined_call_operand.<no memory space> [shape: f32[1,1], index: 7, kind: input, shape index: {}]   ;;  %s646_s8 = inlined_call_operand.hbm [shape: f32[1,8], index: 8, kind: output, shape index: {}]  }
   0x1   :  { %15 = vsyncpa [#allocation7], 0 }
   0x2   :  { %16 = vsyncpa [#allocation10], 0 }
   0x3   :  { %17 = vsyncpa [#allocation5], 0  ;;  %s557_s27 = smov [#allocation6]   ;;  %s558_s29 = smov [#allocation3]  }
   0x4   :  { %s34_s28 = sshll.u32 %s557_s27, 4  ;;  %s24_s30 = sshll.u32 %s558_s29, 4  ;;  %s35_s28 = int_to_ptr.vmem [resolvable:$true] %s34_s28  ;;  %s25_s30 = int_to_ptr.vmem [resolvable:$true] %s24_s30 }
   0x5   :  { %s457_s9 = scalar_lea.vmem %s35_s28, 128  ;;  %p462_p1 = scmp.lt.s32.totalorder %s35_s28, %s35_s28 }
   0x6   :  { %p458_p0 = scmp.ne.s32.totalorder %s35_s28, %s457_s9  ;;  %p463_p2 = scmp.lt.s32.totalorder %s457_s9, %s457_s9 }
   0x8   :  { %p464_p3 = por %p463_p2, %p462_p1 }
   0xa   :  { %p465_p4 = pnand %p464_p3, %p458_p0 }
   0xc   :  { %468 = shalt.err (!%p465_p4)
}
   0xd   :  { %37 = dma.hbm_to_vmem [thread:$0]  %s639_s1, 128, %s35_s28, [#allocation7]  }
   0xe   :  { %s477_s12 = scalar_lea.vmem %s25_s30, 128  ;;  %p482_p6 = scmp.lt.s32.totalorder %s25_s30, %s25_s30 }
   0xf   :  { %p478_p5 = scmp.ne.s32.totalorder %s25_s30, %s477_s12  ;;  %p483_p7 = scmp.lt.s32.totalorder %s477_s12, %s477_s12 }
  0x11   :  { %p484_p8 = por %p483_p7, %p482_p6 }
  0x13   :  { %p485_p9 = pnand %p484_p8, %p478_p5 }
  0x15   :  { %488 = shalt.err (!%p485_p9)
}
  0x16   :  { %27 = dma.hbm_to_vmem [thread:$0]  %s638_s0, 128, %s25_s30, [#allocation4]  }
  0x17   :  { %s559_s15 = smov [#allocation8]  }
  0x18   :  { %s43_s16 = sshll.u32 %s559_s15, 4  ;;  %s44_s16 = int_to_ptr.vmem [resolvable:$true] %s43_s16 }
  0x19   :  { %s497_s17 = scalar_lea.vmem %s44_s16, 1024  ;;  %p502_p11 = scmp.lt.s32.totalorder %s44_s16, %s44_s16 }
  0x1a   :  { %p498_p10 = scmp.ne.s32.totalorder %s44_s16, %s497_s17  ;;  %p503_p12 = scmp.lt.s32.totalorder %s497_s17, %s497_s17 }
  0x1c   :  { %p504_p13 = por %p503_p12, %p502_p11 }
  0x1e   :  { %p505_p0 = pnand %p504_p13, %p498_p10 }
  0x20   :  { %508 = shalt.err (!%p505_p0)
}
  0x21   :  { %s560_s1 = smov 256   ;;  %s561_s18 = smov 16  }
  0x22   :  { %49 = dma.hbm_to_vmem [thread:$0]  %s640_s2, 1024, %s44_s16, [#allocation7], %s560_s1, %s560_s1, %s561_s18  }
  0x23   :  { %s562_s21 = smov [#allocation9]  }
  0x24   :  { %s57_s22 = sshll.u32 %s562_s21, 4  ;;  %s58_s22 = int_to_ptr.vmem [resolvable:$true] %s57_s22 }
  0x25   :  { %s517_s0 = scalar_lea.vmem %s58_s22, 8192  ;;  %p522_p2 = scmp.lt.s32.totalorder %s58_s22, %s58_s22 }
  0x26   :  { %p518_p1 = scmp.ne.s32.totalorder %s58_s22, %s517_s0  ;;  %p523_p3 = scmp.lt.s32.totalorder %s517_s0, %s517_s0 }
  0x28   :  { %p524_p4 = por %p523_p3, %p522_p2 }
  0x2a   :  { %p525_p5 = pnand %p524_p4, %p518_p1 }
  0x2c   :  { %528 = shalt.err (!%p525_p5)
}
  0x2d   :  { %63 = dma.hbm_to_vmem [thread:$0]  %s642_s4, 8192, %s58_s22, [#allocation10], %s560_s1, %s560_s1, %s561_s18  }
  0x2e   :  { %549 = dma.done.wait [#allocation4], 128  }
  0x2f   :  { %550 = vsyncadd [#allocation4], 4294967168 }
  0x30   :  { %551 = dma.done.wait [#allocation7], 1152  }
  0x31   :  { %552 = vsyncadd [#allocation7], 4294966144 }
  0x32   :  { %553 = dma.done.wait [#allocation10], 8192  }
  0x33   :  { %554 = vsyncadd [#allocation10], 4294959104  ;;  %v563_v0 = vmov 0.0   ;;  %v83_v1 = vld [vmem:[#allocation6] sm:$0xff]  ;;  %v96_v3 = vld [vmem:[#allocation8 + $0x30] sm:$0xff]  ;;  %s564_s2 = smov 24  }
  0x34   :  { %178 = vmatprep.mubr.f32.mxu0 %v563_v0  ;;  %v97_v2 = vld [vmem:[#allocation8 + $0x38] sm:$0xff]  ;;  %85 = vrot.lane.b32.xlu0 %v83_v1, %s564_s2  ;;  %v95_v4 = vld [vmem:[#allocation8 + $0x28] sm:$0xff]  ;;  %v94_v5 = vld [vmem:[#allocation8 + $0x20] sm:$0xff]  ;;  %vm88_vm0 = vcmask 195584   ;;  %vm110_vm1 = vcmask 261120   ;;  %s565_s30 = smov [#allocation11]  }
  0x35   :  { %138 = vmatprep.subr.mxu0 %v97_v2  ;;  %v93_v6 = vld [vmem:[#allocation8 + $0x18] sm:$0xff]  ;;  %v92_v7 = vld [vmem:[#allocation8 + $0x10] sm:$0xff]  ;;  %v91_v10 = vld [vmem:[#allocation8 + $0x8] sm:$0xff]  ;;  %s428_s9 = sshll.u32 %s565_s30, 4  ;;  %vm420_vm2 = vcmask 57344   ;;  %s429_s9 = int_to_ptr.vmem [resolvable:$true] %s428_s9 }
  0x36   :  { %139 = vmatpush1.msra.mxu0 %v96_v3  ;;  %v218_v8 = vld [vmem:[#allocation9 + $0xf8] sm:$0xff]  ;;  %v217_v9 = vld [vmem:[#allocation9 + $0xf0] sm:$0xff]  ;;  %v216_v11 = vld [vmem:[#allocation9 + $0xe8] sm:$0xff]  ;;  %s533_s10 = scalar_lea.vmem %s429_s9, 32  ;;  %p534_p7 = scmp.lt.s32.totalorder %s429_s9, %s429_s9 }
  0x37   :  { %140 = vmatprep.subr.mxu0 %v95_v4  ;;  %263 = vmatprep.subr.mxu1 %v218_v8  ;;  %v215_v12 = vld [vmem:[#allocation9 + $0xe0] sm:$0xff]  ;;  %v214_v14 = vld [vmem:[#allocation9 + $0xd8] sm:$0xff]  ;;  %v213_v15 = vld [vmem:[#allocation9 + $0xd0] sm:$0xff] }
  0x38   :  { %141 = vmatpush1.msra.mxu0 %v94_v5  ;;  %v90_v13 = vld [vmem:[#allocation8] sm:$0xff]  ;;  %264 = vmatpush1.msra.mxu1 %v217_v9  ;;  %v212_v16 = vld [vmem:[#allocation9 + $0xc8] sm:$0xff]  ;;  %v210_v18 = vld [vmem:[#allocation9 + $0xb8] sm:$0xff] }
  0x39   :  { %142 = vmatprep.subr.mxu0 %v93_v6  ;;  %265 = vmatprep.subr.mxu1 %v216_v11  ;;  %v211_v17 = vld [vmem:[#allocation9 + $0xc0] sm:$0xff]  ;;  %v209_v19 = vld [vmem:[#allocation9 + $0xb0] sm:$0xff]  ;;  %v208_v20 = vld [vmem:[#allocation9 + $0xa8] sm:$0xff] }
  0x3a   :  { %143 = vmatpush1.msra.mxu0 %v92_v7  ;;  %266 = vmatpush1.msra.mxu1 %v215_v12  ;;  %v207_v21 = vld [vmem:[#allocation9 + $0xa0] sm:$0xff]  ;;  %v206_v22 = vld [vmem:[#allocation9 + $0x98] sm:$0xff]  ;;  %v205_v23 = vld [vmem:[#allocation9 + $0x90] sm:$0xff] }
  0x3b   :  { %144 = vmatprep.subr.mxu0 %v91_v10  ;;  %267 = vmatprep.subr.mxu1 %v214_v14  ;;  %v204_v24 = vld [vmem:[#allocation9 + $0x88] sm:$0xff]  ;;  %v203_v25 = vld [vmem:[#allocation9 + $0x80] sm:$0xff]  ;;  %v202_v26 = vld [vmem:[#allocation9 + $0x78] sm:$0xff] }
  0x3c   :  { %145 = vmatpush1.msra.mxu0 %v90_v13  ;;  %268 = vmatpush1.msra.mxu1 %v213_v15  ;;  %v201_v27 = vld [vmem:[#allocation9 + $0x70] sm:$0xff]  ;;  %v200_v28 = vld [vmem:[#allocation9 + $0x68] sm:$0xff]  ;;  %v199_v29 = vld [vmem:[#allocation9 + $0x60] sm:$0xff]  ;;  %v100_v13 = vlaneseq }
  0x3d   :  { %269 = vmatprep.subr.mxu1 %v212_v16  ;;  %v198_v30 = vld [vmem:[#allocation9 + $0x58] sm:$0xff]  ;;  %v197_v31 = vld [vmem:[#allocation9 + $0x50] sm:$0xff]  ;;  %v196_v32 = vld [vmem:[#allocation9 + $0x48] sm:$0xff] }
  0x3e   :  { %270 = vmatpush1.msra.mxu1 %v211_v17  ;;  %v195_v33 = vld [vmem:[#allocation9 + $0x40] sm:$0xff]  ;;  %v194_v34 = vld [vmem:[#allocation9 + $0x38] sm:$0xff]  ;;  %v193_v35 = vld [vmem:[#allocation9 + $0x30] sm:$0xff]  ;;  %v101_v14 = vshrl.u32 %v100_v13, 7 }
  0x3f   :  { %271 = vmatprep.subr.mxu1 %v210_v18  ;;  %v192_v36 = vld [vmem:[#allocation9 + $0x28] sm:$0xff]  ;;  %v191_v37 = vld [vmem:[#allocation9 + $0x20] sm:$0xff]  ;;  %v190_v38 = vld [vmem:[#allocation9 + $0x18] sm:$0xff] }
  0x40   :  { %272 = vmatpush1.msra.mxu1 %v209_v19  ;;  %v189_v39 = vld [vmem:[#allocation9 + $0x10] sm:$0xff]  ;;  %v188_v40 = vld [vmem:[#allocation9 + $0x8] sm:$0xff]  ;;  %v187_v41 = vld [vmem:[#allocation9] sm:$0xff]  ;;  %v102_v15 = vsub.s32 0, %v101_v14  ;;  %v106_v17 = vsub.s32 1, %v101_v14 }
  0x41   :  { %273 = vmatprep.subr.mxu1 %v208_v20  ;;  %v250_v42 = vld [vmem:[#allocation9 + $0x1f8] sm:$0xff]  ;;  %v249_v43 = vld [vmem:[#allocation9 + $0x1f0] sm:$0xff]  ;;  %v248_v44 = vld [vmem:[#allocation9 + $0x1e8] sm:$0xff] }
  0x42   :  { %274 = vmatpush1.msra.mxu1 %v207_v21  ;;  %v247_v45 = vld [vmem:[#allocation9 + $0x1e0] sm:$0xff]  ;;  %v246_v46 = vld [vmem:[#allocation9 + $0x1d8] sm:$0xff]  ;;  %v245_v47 = vld [vmem:[#allocation9 + $0x1d0] sm:$0xff] }
  0x43   :  { %275 = vmatprep.subr.mxu1 %v206_v22  ;;  %v244_v48 = vld [vmem:[#allocation9 + $0x1c8] sm:$0xff]  ;;  %v243_v49 = vld [vmem:[#allocation9 + $0x1c0] sm:$0xff]  ;;  %v242_v50 = vld [vmem:[#allocation9 + $0x1b8] sm:$0xff] }
  0x44   :  { %276 = vmatpush1.msra.mxu1 %v205_v23  ;;  %v241_v51 = vld [vmem:[#allocation9 + $0x1b0] sm:$0xff]  ;;  %v240_v52 = vld [vmem:[#allocation9 + $0x1a8] sm:$0xff]  ;;  %v239_v53 = vld [vmem:[#allocation9 + $0x1a0] sm:$0xff] }
  0x45   :  { %277 = vmatprep.subr.mxu1 %v204_v24  ;;  %v238_v54 = vld [vmem:[#allocation9 + $0x198] sm:$0xff]  ;;  %v237_v55 = vld [vmem:[#allocation9 + $0x190] sm:$0xff]  ;;  %v236_v56 = vld [vmem:[#allocation9 + $0x188] sm:$0xff] }
  0x46   :  { %278 = vmatpush1.msra.mxu1 %v203_v25  ;;  %v235_v57 = vld [vmem:[#allocation9 + $0x180] sm:$0xff]  ;;  %v234_v58 = vld [vmem:[#allocation9 + $0x178] sm:$0xff]  ;;  %v233_v59 = vld [vmem:[#allocation9 + $0x170] sm:$0xff] }
  0x47   :  { %279 = vmatprep.subr.mxu1 %v202_v26  ;;  %v232_v60 = vld [vmem:[#allocation9 + $0x168] sm:$0xff]  ;;  %v231_v61 = vld [vmem:[#allocation9 + $0x160] sm:$0xff]  ;;  %v230_v62 = vld [vmem:[#allocation9 + $0x158] sm:$0xff] }
  0x48   :  { %280 = vmatpush1.msra.mxu1 %v201_v27  ;;  %v229_v63 = vld [vmem:[#allocation9 + $0x150] sm:$0xff]  ;;  %v228_v0 = vld [vmem:[#allocation9 + $0x148] sm:$0xff]  ;;  %v227_v1 = vld [vmem:[#allocation9 + $0x140] sm:$0xff] }
  0x49   :  { %281 = vmatprep.subr.mxu1 %v200_v28  ;;  %v82_v2 = vld [vmem:[#allocation3] sm:$0xff]  ;;  %v226_v5 = vld [vmem:[#allocation9 + $0x138] sm:$0xff]  ;;  %v224_v7 = vld [vmem:[#allocation9 + $0x128] sm:$0xff] }
  0x4a   :  { %282 = vmatpush1.msra.mxu1 %v199_v29  ;;  %v225_v6 = vld [vmem:[#allocation9 + $0x130] sm:$0xff]  ;;  %v223_v8 = vld [vmem:[#allocation9 + $0x120] sm:$0xff]  ;;  %v222_v9 = vld [vmem:[#allocation9 + $0x118] sm:$0xff] }
  0x4b   :  { %283 = vmatprep.subr.mxu1 %v198_v30  ;;  %v221_v10 = vld [vmem:[#allocation9 + $0x110] sm:$0xff]  ;;  %v220_v11 = vld [vmem:[#allocation9 + $0x108] sm:$0xff]  ;;  %v219_v12 = vld [vmem:[#allocation9 + $0x100] sm:$0xff] }
  0x4c   :  { %284 = vmatpush1.msra.mxu1 %v197_v31  ;;  %v98_v16 = vld [vmem:[%s641_s3] sm:$0x3] }
  0x4d   :  { %285 = vmatprep.subr.mxu1 %v196_v32  ;;  %v103_v18 = vrot.slane %v98_v16, %v102_v15  ;;  %v107_v19 = vrot.slane %v98_v16, %v106_v17  ;;  %v336_v26 = vld [vmem:[%s644_s6] sm:$0x3] }
  0x4e   :  { %286 = vmatpush1.msra.mxu1 %v195_v33  ;;  %v347_v27 = vrot.slane %v336_v26, %v106_v17  ;;  %v251_v28 = vld [vmem:[%s643_s5] sm:$0x3]  ;;  %s529_s5 = scalar_lea.vmem %s429_s9, 16 }
  0x4f   :  { %287 = vmatprep.subr.mxu1 %v194_v34  ;;  %v256_v29 = vrot.slane %v251_v28, %v102_v15  ;;  %v260_v30 = vrot.slane %v251_v28, %v106_v17  ;;  %p530_p6 = scmp.ne.s32.totalorder %s429_s9, %s529_s5  ;;  %p535_p8 = scmp.lt.s32.totalorder %s533_s10, %s529_s5 }
  0x50   :  { %288 = vmatpush1.msra.mxu1 %v193_v35 }
  0x51   :  { %289 = vmatprep.subr.mxu1 %v192_v36  ;;  %p536_p9 = por %p535_p8, %p534_p7 }
  0x52   :  { %290 = vmatpush1.msra.mxu1 %v191_v37  ;;  %v343_v37 = vrot.slane %v336_v26, %v102_v15 }
  0x53   :  { %291 = vmatprep.subr.mxu1 %v190_v38  ;;  %v338_v38 = vstv %s645_s7  ;;  %p537_p10 = pnand %p536_p9, %p530_p6 }
  0x54   :  { %292 = vmatpush1.msra.mxu1 %v189_v39 }
  0x55   :  { %293 = vmatprep.subr.mxu1 %v188_v40 }
  0x56   :  { %294 = vmatpush1.msra.mxu1 %v187_v41 }
  0x57   :  { %295 = vmatprep.subr.mxu1 %v250_v42 }
  0x58   :  { %296 = vmatpush2.msra.mxu1 %v249_v43 }
  0x59   :  { %297 = vmatprep.subr.mxu1 %v248_v44 }
  0x5a   :  { %298 = vmatpush2.msra.mxu1 %v247_v45 }
  0x5b   :  { %299 = vmatprep.subr.mxu1 %v246_v46 }
  0x5c   :  { %300 = vmatpush2.msra.mxu1 %v245_v47 }
  0x5d   :  { %301 = vmatprep.subr.mxu1 %v244_v48 }
  0x5e   :  { %302 = vmatpush2.msra.mxu1 %v243_v49 }
  0x5f   :  { %303 = vmatprep.subr.mxu1 %v242_v50 }
  0x60   :  { %304 = vmatpush2.msra.mxu1 %v241_v51 }
  0x61   :  { %305 = vmatprep.subr.mxu1 %v240_v52 }
  0x62   :  { %306 = vmatpush2.msra.mxu1 %v239_v53 }
  0x63   :  { %307 = vmatprep.subr.mxu1 %v238_v54 }
  0x64   :  { %308 = vmatpush2.msra.mxu1 %v237_v55 }
  0x65   :  { %309 = vmatprep.subr.mxu1 %v236_v56 }
  0x66   :  { %310 = vmatpush2.msra.mxu1 %v235_v57 }
  0x67   :  { %311 = vmatprep.subr.mxu1 %v234_v58 }
  0x68   :  { %312 = vmatpush2.msra.mxu1 %v233_v59 }
  0x69   :  { %313 = vmatprep.subr.mxu1 %v232_v60 }
  0x6a   :  { %314 = vmatpush2.msra.mxu1 %v231_v61 }
  0x6b   :  { %315 = vmatprep.subr.mxu1 %v230_v62 }
  0x6c   :  { %316 = vmatpush2.msra.mxu1 %v229_v63 }
  0x6d   :  { %317 = vmatprep.subr.mxu1 %v228_v0 }
  0x6e   :  { %318 = vmatpush2.msra.mxu1 %v227_v1 }
  0x6f   :  { %319 = vmatprep.subr.mxu1 %v226_v5 }
  0x70   :  { %320 = vmatpush2.msra.mxu1 %v225_v6 }
  0x71   :  { %321 = vmatprep.subr.mxu1 %v224_v7 }
  0x72   :  { %322 = vmatpush2.msra.mxu1 %v223_v8 }
  0x73   :  { %323 = vmatprep.subr.mxu1 %v222_v9 }
  0x74   :  { %324 = vmatpush2.msra.mxu1 %v221_v10 }
  0x75   :  { %325 = vmatprep.subr.mxu1 %v220_v11 }
  0x76   :  { %326 = vmatpush2.msra.mxu1 %v219_v12 }
  0xa6   :  { %v86_v3 = vpop.permute.xlu0 %85 }
  0xa7   :  { %v89_v4 = vsel %vm88_vm0, %v82_v2, %v86_v3 }
  0xa8   :  { %439 = vmatmul.mubr.msk.f32.vlgmr.msra.gmra.mxu0 %vm110_vm1, %v89_v4 }
  0xa9   :  { %414 = vmatprep.mubr.f32.mxu0 %v347_v27 }
 0x168   :  { %v180_v20 = vpop.f32.mrf.mxu0 }
 0x169   :  { %v181_v21 = vadd.f32 %v180_v20, %v103_v18 }
 0x16a   :  { %v182_v22 = vpop.f32.mrf.mxu0 }
 0x16b   :  { %v183_v23 = vadd.f32 %v182_v22, %v107_v19  ;;  %v185_v25 = vmax.f32 %v181_v21, 0.0 }
 0x16d   :  { %v186_v24 = vmax.f32 %v183_v23, 0.0 }
 0x16f   :  { %327 = vmatprep.mubr.f32.mxu1 %v186_v24 }
 0x170   :  { %328 = vmatmul.mubr.f32.vlgmr.msra.gmra.mxu1 %v185_v25 }
 0x230   :  { %v329_v31 = vpop.f32.mrf.mxu1 }
 0x231   :  { %v330_v32 = vadd.f32 %v329_v31, %v256_v29 }
 0x232   :  { %v331_v33 = vpop.f32.mrf.mxu1 }
 0x233   :  { %v332_v34 = vadd.f32 %v331_v33, %v260_v30  ;;  %v334_v36 = vmax.f32 %v330_v32, 0.0 }
 0x235   :  { %v335_v35 = vmax.f32 %v332_v34, 0.0 }
 0x237   :  { %380 = vmatprep.subr.mxu0 %v335_v35 }
 0x238   :  { %381 = vmatpush1.xpose.msra.mxu0 %v334_v36 }
 0x23b   :  { %415 = vmatmul.mubr.f32.vlgmr.msra.gmra.mxu0 %v343_v37 }
 0x2fb   :  { %v416_v39 = vpop.f32.mrf.mxu0 }
 0x2fc   :  { %v417_v40 = vadd.f32 %v416_v39, %v338_v38 }
 0x2fd   :  { %v418_v41 = vpop.f32.mrf.mxu0 }
 0x2fe   :  { %421 = vst.msk [vmem:[#allocation11] sm:$0x1] %vm420_vm2, %v417_v40 }
 0x2ff   :  { %540 = shalt.err (!%p537_p10)
}
 0x300   :  { %431 = dma.vmem_to_hbm [thread:$0]  %s429_s9, 16, %s646_s8, [#allocation5]  }
 0x301   :  { %555 = dma.done.wait [#allocation5], 16  }
 0x302   :  { %556 = vsyncadd [#allocation5], 4294967280 }
 0x303   :  { %435 = vsyncpa [#allocation4], 1 }
 0x304   :  { %436 = vsyncpa [#allocation7], 1 }
 0x305   :  { %437 = vsyncpa [#allocation10], 1 }
 0x306   :  { %438 = vsyncpa [#allocation5], 1 }

</bundles_post_ra>
